<compile_context>
chip_gen: v6e
topology: v6e:2x2x1
jax: 0.10.0
libtpu: 0.0.40
codegen_flags: <defaults>
</compile_context>

<pallas_src>
import functools

import jax
import jax.numpy as jnp
from jax.experimental import pallas as pl
from jax.experimental.pallas import tpu as pltpu


def conv_encoder_kernel(ids_ref, tab_ref, w_ref, b_ref, out_ref, flat_ref, *,
                        window, seq_len):
    # ids_ref : (rows, 1)        int32   token ids for this block (rows = bt*S)
    # tab_ref : (V, E)           f32     embedding table (resident block)
    # w_ref   : (K_pad, O_pad)   f32     flattened conv weight (resident block)
    # b_ref   : (1, O_pad)       f32
    # out_ref : (rows, O_pad)    f32     lane-dense output slab
    # flat_ref: (bt, S, K_pad)   f32     VMEM scratch holding the flattened windows
    rows = ids_ref.shape[0]
    V, E = tab_ref.shape
    K_pad = flat_ref.shape[-1]
    S = seq_len
    bt = rows // S
    K = window * E
    p = (window - 1) // 2

    # --- fused embedding gather: one-hot (rows, V) @ (V, E) on the MXU --------
    # Exact (one 1.0 per row); avoids the wrapper-side (B, S, E) HBM round trip.
    ids = ids_ref[...]                                             # (rows, 1)
    vocab_iota = jax.lax.broadcasted_iota(jnp.int32, (rows, V), 1)
    onehot = (vocab_iota == ids).astype(jnp.float32)               # (rows, V)
    x = jnp.dot(onehot, tab_ref[...], preferred_element_type=jnp.float32)
    x = x.reshape(bt, S, E)                                        # (bt, S, E)

    # --- build flattened windows directly in the VMEM scratch -----------------
    # One store pass per tap (no concat-with-zeros intermediates).  Halo rows /
    # pad columns are rewritten as zeros every step: the scratch is per-core, so
    # we cannot rely on a program_id == 0 init under megacore grid splitting.
    for t in range(window):                                        # static unroll
        d = t - p                                                  # sequence offset
        c0, c1 = t * E, (t + 1) * E
        if d == 0:
            flat_ref[:, :, c0:c1] = x
            continue
        h = min(abs(d), S)                                         # halo rows
        if d < 0:
            flat_ref[:, 0:h, c0:c1] = jnp.zeros((bt, h, E), jnp.float32)
            if S - h > 0:
                flat_ref[:, h:S, c0:c1] = x[:, 0:S - h, :]
        else:
            if S - h > 0:
                flat_ref[:, 0:S - h, c0:c1] = x[:, h:S, :]
            flat_ref[:, S - h:S, c0:c1] = jnp.zeros((bt, h, E), jnp.float32)
    if K_pad > K:                                                  # static
        flat_ref[:, :, K:K_pad] = jnp.zeros((bt, S, K_pad - K), jnp.float32)

    # --- single fused MXU matmul over all rows of the block -------------------
    flat = flat_ref[...].reshape(rows, K_pad)
    y = jnp.dot(flat, w_ref[...], preferred_element_type=jnp.float32)
    y = y + b_ref[...]                                             # (1, O_pad) bcast

    # Exact (erf-based) GELU, matching torch.nn.GELU() default.
    inv_sqrt2 = jnp.float32(0.7071067811865476)
    y = 0.5 * y * (1.0 + jax.lax.erf(y * inv_sqrt2))

    out_ref[...] = y.astype(out_ref.dtype)


def conv_encoder_forward(x_ids, emb_table, W_torch, b, window_size, *,
                         pad_idx=0, target_rows=512,
                         vmem_budget_bytes=28 * 1024 * 1024):
    """x_ids: (B, S) int32 -> (B, S, out_size) float32.

    emb_table: (vocab_size, emb_size) with the pad_idx row already zeroed.
    W_torch  : PyTorch nn.Linear weight, shape (out_size, window_size * emb_size).
    b        : PyTorch nn.Linear bias,   shape (out_size,).
    """
    B, S = x_ids.shape
    V, E = emb_table.shape
    O = W_torch.shape[0]
    K = window_size * E
    K_pad = ((K + 127) // 128) * 128                  # full MXU contraction dim
    O_pad = ((O + 127) // 128) * 128                  # lane-dense output width

    # Flattened (window-major, emb-minor) weight, zero-padded on K and O.
    W_flat = jnp.zeros((K_pad, O_pad), jnp.float32)
    W_flat = W_flat.at[:K, :O].set(W_torch.T.astype(jnp.float32))
    b_pad = jnp.zeros((1, O_pad), jnp.float32).at[0, :O].set(b.astype(jnp.float32))

    # --- row tiling: whole batch elements per block, decoupled from B ---------
    bt = max(1, min(B, target_rows // max(S, 1)))
    if B >= 2:
        bt = min(bt, -(-B // 2))          # keep >= 2 grid steps (v7x: 2 TCs/chip)

    def _block_bytes(bt_):
        rows_ = bt_ * S
        return 4 * (rows_ * K_pad                   # flat scratch
                    + rows_ * (E + V + O_pad)       # x / one-hot / y temporaries
                    + 2 * rows_ * O_pad             # double-buffered output block
                    + 2 * rows_                     # ids block
                    + 2 * V * E                     # resident emb table
                    + 2 * K_pad * O_pad             # resident weight
                    + 2 * O_pad)

    while bt > 1 and _block_bytes(bt) > vmem_budget_bytes:
        bt = max(1, bt // 2)

    G = -(-B // bt)                                   # grid steps
    B_pad = G * bt
    rows = bt * S

    ids = x_ids.astype(jnp.int32)
    if B_pad > B:                                     # padded rows -> pad tokens
        ids = jnp.pad(ids, ((0, B_pad - B), (0, 0)), constant_values=pad_idx)
    ids = ids.reshape(G, rows, 1)

    flops = 2 * B_pad * S * (V * E + K_pad * O_pad) + 8 * B_pad * S * O_pad
    bytes_accessed = 4 * (B_pad * S + V * E + K_pad * O_pad + O_pad
                          + B_pad * S * O_pad)

    out = pl.pallas_call(
        functools.partial(conv_encoder_kernel, window=window_size, seq_len=S),
        out_shape=jax.ShapeDtypeStruct((G, rows, O_pad), jnp.float32),
        grid=(G,),
        in_specs=[
            pl.BlockSpec((None, rows, 1), lambda i: (i, 0, 0)),      # ids
            pl.BlockSpec((V, E), lambda i: (0, 0)),                  # emb table
            pl.BlockSpec((K_pad, O_pad), lambda i: (0, 0)),          # weight
            pl.BlockSpec((1, O_pad), lambda i: (0, 0)),              # bias
        ],
        out_specs=pl.BlockSpec((None, rows, O_pad), lambda i: (i, 0, 0)),
        scratch_shapes=[pltpu.VMEM((bt, S, K_pad), jnp.float32)],
        compiler_params=pltpu.CompilerParams(
            dimension_semantics=("parallel",),
            vmem_limit_bytes=48 * 1024 * 1024),
        cost_estimate=pl.CostEstimate(
            flops=flops,
            transcendentals=B_pad * S * O_pad,
            bytes_accessed=bytes_accessed),
    )(ids, emb_table.astype(jnp.float32), W_flat, b_pad)

    return out.reshape(B_pad, S, O_pad)[:B, :, :O]


def reference_forward(x_ids, emb_table, W_torch, b, window_size):
    """Pure-JAX reference of the PyTorch forward (for correctness check)."""
    B, S = x_ids.shape
    p = (window_size - 1) // 2
    emb = emb_table[x_ids]
    emb_pad = jnp.pad(emb, ((0, 0), (p, p), (0, 0)))
    wins = jnp.stack([emb_pad[:, w:w + S, :] for w in range(window_size)], axis=2)
    flat = wins.reshape(B, S, window_size * emb_table.shape[1])
    y = flat @ W_torch.T + b
    return 0.5 * y * (1.0 + jax.lax.erf(y * 0.7071067811865476))


if __name__ == "__main__":
    # Small, deterministic configuration consistent with the module.
    B, S = 3, 8                       # B=3 exercises batch padding + 2-step grid
    emb_size, window_size, out_size = 32, 3, 32
    vocab_size, pad_idx = 16, 0

    key = jax.random.PRNGKey(0)
    k_emb, k_w, k_b, k_x = jax.random.split(key, 4)

    # nn.Embedding(vocab, emb, padding_idx=pad_idx): zero the pad row.
    emb_table = jax.random.normal(k_emb, (vocab_size, emb_size), jnp.float32) * 0.1
    emb_table = emb_table.at[pad_idx].set(0.0)

    # nn.Linear(emb_size*window_size, out_size): weight (O, window*E), bias (O,)
    W_torch = jax.random.normal(k_w, (out_size, window_size * emb_size),
                                jnp.float32) * 0.05
    bias = jax.random.normal(k_b, (out_size,), jnp.float32) * 0.05

    # Batch of padded token-id sequences (some trailing pad tokens).
    x_ids = jax.random.randint(k_x, (B, S), 1, vocab_size, dtype=jnp.int32)
    x_ids = x_ids.at[0, S - 2:].set(pad_idx)
    x_ids = x_ids.at[1, S - 1:].set(pad_idx)
    x_ids = x_ids.at[2, S - 3:].set(pad_idx)

    out = conv_encoder_forward(x_ids, emb_table, W_torch, bias, window_size,
                               pad_idx=pad_idx)
    out = jax.block_until_ready(out)

    ref = reference_forward(x_ids, emb_table, W_torch, bias, window_size)
    assert out.shape == (B, S, out_size)
    assert jnp.allclose(out, ref, atol=1e-5, rtol=1e-5), "mismatch vs reference"

    print("KERNEL_OK")
</pallas_src>

<mosaic_0001>
module attributes {stable_mosaic.version = 11 : i64} {
  func.func @conv_encoder_kernel(%arg0: i32, %arg1: memref<1x16x1xi32, #tpu.memory_space<vmem>>, %arg2: memref<16x32xf32, #tpu.memory_space<vmem>>, %arg3: memref<128x128xf32, #tpu.memory_space<vmem>>, %arg4: memref<1x128xf32, #tpu.memory_space<vmem>>, %arg5: memref<1x16x128xf32, #tpu.memory_space<vmem>>, %arg6: memref<2x8x128xf32, #tpu.memory_space<vmem>>) attributes {dimension_semantics = [#tpu.dimension_semantics<parallel>], iteration_bounds = array<i64: 2>, scalar_prefetch = 0 : i64, scratch_operands = 1 : i64, tpu.core_type = #tpu.core_type<tc>, window_params = [{transform_indices = @transform_0, window_bounds = array<i64: 1, 16, 1>}, {pipeline_mode = #tpu.pipeline_mode<synchronous>, transform_indices = @transform_1, window_bounds = array<i64: 16, 32>}, {pipeline_mode = #tpu.pipeline_mode<synchronous>, transform_indices = @transform_2, window_bounds = array<i64: 128, 128>}, {pipeline_mode = #tpu.pipeline_mode<synchronous>, transform_indices = @transform_3, window_bounds = array<i64: 1, 128>}, {transform_indices = @transform_4, window_bounds = array<i64: 1, 16, 128>}]} {
    %c0 = arith.constant 0 : index
    %c0_0 = arith.constant 0 : index
    %c0_1 = arith.constant 0 : index
    %0 = vector.load %arg1[%c0, %c0_0, %c0_1] : memref<1x16x1xi32, #tpu.memory_space<vmem>>, vector<1x16x1xi32>
    %1 = vector.shape_cast %0 : vector<1x16x1xi32> to vector<16x1xi32>
    %2 = tpu.iota {dimensions = array<i32: 1>} : vector<16x16xi32>
    %3 = vector.broadcast %1 : vector<16x1xi32> to vector<16x16xi32>
    %4 = arith.cmpi eq, %2, %3 : vector<16x16xi32>
    %5 = arith.extui %4 : vector<16x16xi1> to vector<16x16xi32>
    %6 = arith.sitofp %5 : vector<16x16xi32> to vector<16x16xf32>
    %c0_2 = arith.constant 0 : index
    %c0_3 = arith.constant 0 : index
    %7 = vector.load %arg2[%c0_2, %c0_3] : memref<16x32xf32, #tpu.memory_space<vmem>>, vector<16x32xf32>
    %cst = arith.constant dense<0.000000e+00> : vector<16x32xf32>
    %8 = tpu.matmul %6, %7, %cst {dimension_numbers = #tpu.dot_dimension_numbers<[1], [0], [0], [1], [0, 0, 1, 1], [], []>} : vector<16x16xf32>, vector<16x32xf32>, vector<16x32xf32> -> vector<16x32xf32>
    %9 = vector.shape_cast %8 : vector<16x32xf32> to vector<2x8x32xf32>
    %cst_4 = arith.constant 0.000000e+00 : f32
    %10 = vector.broadcast %cst_4 : f32 to vector<2x1x32xf32>
    %c0_5 = arith.constant 0 : index
    %c0_6 = arith.constant 0 : index
    %c0_7 = arith.constant 0 : index
    %11 = vector.load %arg6[%c0_5, %c0_6, %c0_7] : memref<2x8x128xf32, #tpu.memory_space<vmem>>, vector<2x1x32xf32>
    tpu.vector_store %arg6[%c0_5, %c0_6, %c0_7], %10 {strides = array<i32>} : memref<2x8x128xf32, #tpu.memory_space<vmem>>, vector<2x1x32xf32>,
    %12 = vector.extract_strided_slice %9 {offsets = [0, 0, 0], sizes = [2, 7, 32], strides = [1, 1, 1]} : vector<2x8x32xf32> to vector<2x7x32xf32>
    %c0_8 = arith.constant 0 : index
    %c1 = arith.constant 1 : index
    %c0_9 = arith.constant 0 : index
    %13 = vector.load %arg6[%c0_8, %c1, %c0_9] : memref<2x8x128xf32, #tpu.memory_space<vmem>>, vector<2x7x32xf32>
    tpu.vector_store %arg6[%c0_8, %c1, %c0_9], %12 {strides = array<i32>} : memref<2x8x128xf32, #tpu.memory_space<vmem>>, vector<2x7x32xf32>,
    %c0_10 = arith.constant 0 : index
    %c0_11 = arith.constant 0 : index
    %c32 = arith.constant 32 : index
    %14 = vector.load %arg6[%c0_10, %c0_11, %c32] : memref<2x8x128xf32, #tpu.memory_space<vmem>>, vector<2x8x32xf32>
    tpu.vector_store %arg6[%c0_10, %c0_11, %c32], %9 {strides = array<i32>} : memref<2x8x128xf32, #tpu.memory_space<vmem>>, vector<2x8x32xf32>,
    %15 = vector.extract_strided_slice %9 {offsets = [0, 1, 0], sizes = [2, 7, 32], strides = [1, 1, 1]} : vector<2x8x32xf32> to vector<2x7x32xf32>
    %c0_12 = arith.constant 0 : index
    %c0_13 = arith.constant 0 : index
    %c64 = arith.constant 64 : index
    %16 = vector.load %arg6[%c0_12, %c0_13, %c64] : memref<2x8x128xf32, #tpu.memory_space<vmem>>, vector<2x7x32xf32>
    tpu.vector_store %arg6[%c0_12, %c0_13, %c64], %15 {strides = array<i32>} : memref<2x8x128xf32, #tpu.memory_space<vmem>>, vector<2x7x32xf32>,
    %cst_14 = arith.constant 0.000000e+00 : f32
    %17 = vector.broadcast %cst_14 : f32 to vector<2x1x32xf32>
    %c0_15 = arith.constant 0 : index
    %c7 = arith.constant 7 : index
    %c64_16 = arith.constant 64 : index
    %18 = vector.load %arg6[%c0_15, %c7, %c64_16] : memref<2x8x128xf32, #tpu.memory_space<vmem>>, vector<2x1x32xf32>
    tpu.vector_store %arg6[%c0_15, %c7, %c64_16], %17 {strides = array<i32>} : memref<2x8x128xf32, #tpu.memory_space<vmem>>, vector<2x1x32xf32>,
    %cst_17 = arith.constant 0.000000e+00 : f32
    %19 = vector.broadcast %cst_17 : f32 to vector<2x8x32xf32>
    %c0_18 = arith.constant 0 : index
    %c0_19 = arith.constant 0 : index
    %c96 = arith.constant 96 : index
    %20 = vector.load %arg6[%c0_18, %c0_19, %c96] : memref<2x8x128xf32, #tpu.memory_space<vmem>>, vector<2x8x32xf32>
    tpu.vector_store %arg6[%c0_18, %c0_19, %c96], %19 {strides = array<i32>} : memref<2x8x128xf32, #tpu.memory_space<vmem>>, vector<2x8x32xf32>,
    %c0_20 = arith.constant 0 : index
    %c0_21 = arith.constant 0 : index
    %c0_22 = arith.constant 0 : index
    %21 = vector.load %arg6[%c0_20, %c0_21, %c0_22] : memref<2x8x128xf32, #tpu.memory_space<vmem>>, vector<2x8x128xf32>
    %22 = vector.shape_cast %21 : vector<2x8x128xf32> to vector<16x128xf32>
    %c0_23 = arith.constant 0 : index
    %c0_24 = arith.constant 0 : index
    %23 = vector.load %arg3[%c0_23, %c0_24] : memref<128x128xf32, #tpu.memory_space<vmem>>, vector<128x128xf32>
    %cst_25 = arith.constant dense<0.000000e+00> : vector<16x128xf32>
    %24 = tpu.matmul %22, %23, %cst_25 {dimension_numbers = #tpu.dot_dimension_numbers<[1], [0], [0], [1], [0, 0, 1, 1], [], []>} : vector<16x128xf32>, vector<128x128xf32>, vector<16x128xf32> -> vector<16x128xf32>
    %c0_26 = arith.constant 0 : index
    %c0_27 = arith.constant 0 : index
    %25 = vector.load %arg4[%c0_26, %c0_27] : memref<1x128xf32, #tpu.memory_space<vmem>>, vector<1x128xf32>
    %26 = vector.broadcast %25 : vector<1x128xf32> to vector<16x128xf32>
    %27 = arith.addf %24, %26 : vector<16x128xf32>
    %cst_28 = arith.constant 5.000000e-01 : f32
    %28 = vector.broadcast %cst_28 : f32 to vector<16x128xf32>
    %29 = arith.mulf %28, %27 : vector<16x128xf32>
    %cst_29 = arith.constant 0.707106769 : f32
    %30 = vector.broadcast %cst_29 : f32 to vector<16x128xf32>
    %31 = arith.mulf %27, %30 : vector<16x128xf32>
    %32 = math.erf %31 : vector<16x128xf32>
    %cst_30 = arith.constant 1.000000e+00 : f32
    %33 = vector.broadcast %cst_30 : f32 to vector<16x128xf32>
    %34 = arith.addf %33, %32 : vector<16x128xf32>
    %35 = arith.mulf %29, %34 : vector<16x128xf32>
    %c0_31 = arith.constant 0 : index
    %c0_32 = arith.constant 0 : index
    %c0_33 = arith.constant 0 : index
    %36 = vector.load %arg5[%c0_31, %c0_32, %c0_33] : memref<1x16x128xf32, #tpu.memory_space<vmem>>, vector<1x16x128xf32>
    %37 = vector.shape_cast %36 : vector<1x16x128xf32> to vector<16x128xf32>
    %38 = vector.shape_cast %35 : vector<16x128xf32> to vector<1x16x128xf32>
    tpu.vector_store %arg5[%c0_31, %c0_32, %c0_33], %38 {strides = array<i32>} : memref<1x16x128xf32, #tpu.memory_space<vmem>>, vector<1x16x128xf32>,
    return
  }
  func.func @transform_0(%arg0: i32) -> (i32, i32, i32) {
    %c0_i32 = arith.constant 0 : i32
    %c0_i32_0 = arith.constant 0 : i32
    %c0_i32_1 = arith.constant 0 : i32
    return %arg0, %c0_i32, %c0_i32_0 : i32, i32, i32
  }
  func.func @transform_1(%arg0: i32) -> (i32, i32) {
    %c0_i32 = arith.constant 0 : i32
    %c0_i32_0 = arith.constant 0 : i32
    %c0_i32_1 = arith.constant 0 : i32
    return %c0_i32, %c0_i32_0 : i32, i32
  }
  func.func @transform_2(%arg0: i32) -> (i32, i32) {
    %c0_i32 = arith.constant 0 : i32
    %c0_i32_0 = arith.constant 0 : i32
    %c0_i32_1 = arith.constant 0 : i32
    return %c0_i32, %c0_i32_0 : i32, i32
  }
  func.func @transform_3(%arg0: i32) -> (i32, i32) {
    %c0_i32 = arith.constant 0 : i32
    %c0_i32_0 = arith.constant 0 : i32
    %c0_i32_1 = arith.constant 0 : i32
    return %c0_i32, %c0_i32_0 : i32, i32
  }
  func.func @transform_4(%arg0: i32) -> (i32, i32, i32) {
    %c0_i32 = arith.constant 0 : i32
    %c0_i32_0 = arith.constant 0 : i32
    %c0_i32_1 = arith.constant 0 : i32
    return %arg0, %c0_i32, %c0_i32_0 : i32, i32, i32
  }
}

</mosaic_0001>

<bundles_post_ra>
// kernel: tpu_custom_call.1
= control target key start
LH: loop header
LB: loop body
LE: loop exit
PB: predicated region body
PF: predicated region fallthrough
CT: control target
= control target key end

     0   :  { %9 = vsyncpa [#allocation4], 0  ;;  %s955_s0 = inlined_call_operand.vmem [shape: s32[2,16,1], index: 0, kind: input, shape index: {}]   ;;  %s956_s1 = inlined_call_operand.vmem [shape: f32[16,32], index: 1, kind: input, shape index: {}]   ;;  %s957_s2 = inlined_call_operand.hbm [shape: f32[128,128], index: 2, kind: input, shape index: {}]   ;;  %s958_s3 = inlined_call_operand.vmem [shape: f32[1,128], index: 3, kind: input, shape index: {}]   ;;  %s959_s4 = inlined_call_operand.hbm [shape: f32[2,16,128], index: 4, kind: output, shape index: {}]  }
   0x1   :  { %10 = vsyncpa [#allocation5], 0 }
   0x2   :  { %12 = vsyncpa [#allocation5 + $0x1], 0  ;;  %s818_s15 = smov 0   ;;  %s820_s16 = smov 0  }
   0x3   :  { %s822_s17 = smov 0   ;;  %s824_s18 = smov 0  }
   0x4 LB: > { %s839_s19 = sadd.s32 4294967295, %s781_s18   ;;  %s543_s20 = sadd.s32 4294967294, %s781_s18   ;;  %s781_s18 = sphi %s824_s18, %s967_s18   ;;  %s777_s17 = sphi %s822_s17, %s966_s17   ;;  %s773_s16 = sphi %s820_s16, %s965_s16   ;;  %s769_s15 = sphi %s818_s15, %s964_s15  }
   0x5   : > { %s843_s21 = sadd.s32 1, %s781_s18   ;;  %s114_s22 = sadd.s32 1, %s777_s17 }
   0x6   : > { %s111_s23 = ssub.s32 %s781_s18, %s843_s21  ;;  %p124_p0 = scmp.ne.s32.totalorder %s777_s17, %s773_s16 }
   0x7   : > { %p112_p1 = scmp.eq.s32.totalorder %s111_s23, 0  ;;  %p125_p2 = scmp.eq.s32.totalorder %s839_s19, 1 }
   0x8   : > { %p130_p3 = scmp.ne.s32.totalorder %s773_s16, %s769_s15  ;;  %p131_p4 = scmp.eq.s32.totalorder %s543_s20, 1 }
   0x9   : > { %s854_s24 = scalar_select %p112_p1, %s777_s17, %s114_s22  }
   0xa   : > { %p856_p5 = por %p125_p2, %p124_p0  ;;  %p860_p6 = por %p131_p4, %p130_p3 }
   0xb   : > { %p544_p7 = scmp.ge.s32.totalorder %s781_s18, 1  ;;  %p138_p8 = scmp.lt.s32.totalorder %s781_s18, 3 }
   0xc   : > { %s961_s26 = scalar_select %p860_p6, 1, 0 }
   0xd   : > { %p642_p9 = scmp.eq.s32.totalorder %s839_s19, 0  ;;  %p867_p10 = pnand %p544_p7, %p138_p8 }
   0xe   : > { %s783_s28 = smov [#allocation3]  }
   0xf   : > { %s153_s29 = sshll.u32 %s783_s28, 4  ;;  %p634_p11 = pneg %p867_p10  ;;  %s154_s29 = int_to_ptr.vmem [resolvable:$true] %s153_s29 }
  0x10   : > { %s702_s30 = scalar_lea.vmem %s154_s29, 2048  ;;  %p710_p3 = scmp.lt.s32.totalorder %s154_s29, %s154_s29 }
  0x11   : > { %p635_p12 = pnand %p642_p9, %p634_p11  ;;  %p703_p0 = scmp.ne.s32.totalorder %s154_s29, %s702_s30 }
  0x12   : > { %p711_p4 = scmp.lt.s32.totalorder %s702_s30, %s702_s30 }
  0x13   : > { %p693_p13 = pneg %p635_p12 }
  0x14   : > { %p712_p6 = por %p711_p4, %p710_p3 }
  0x15   : > { %p705_p1 = pnand %p703_p0, %p693_p13 }
  0x17   : > { %p706_p2 = pneg %p705_p1 }
  0x19   : > { %p713_p7 = pnand %p712_p6, %p706_p2 }
  0x1b   : > { %716 = shalt.err (!%p713_p7)
}
  0x1c   : > { %s784_s5 = smov 128   ;;  %s785_s6 = smov 8  }
  0x1d   : > { %637 = dma.hbm_to_vmem [thread:$0]  (!%p635_p12), %s957_s2, 2048, %s154_s29, [#allocation4], %s784_s5, %s784_s5, %s785_s6  }
  0x1e   : > { %180 = sbr.rel (%p867_p10) target bundleno = 729 (0x2d9), region = 36 }
  0x23   : > { %760 = dma.done.wait (%p642_p9), [#allocation4], 2048  }
  0x24   : > { %762 = vsyncadd (%p642_p9), [#allocation4], 4294965248  ;;  %p206_p8 = scmp.lt.s32.totalorder %s839_s19, 1  ;;  %v786_v0 = vmov 0   ;;  %v228_v2 = vld [vmem:[%s956_s1 + $0x8] sm:$0xff]  ;;  %v227_v3 = vld [vmem:[%s956_s1] sm:$0xff]  ;;  %v213_v5 = vlaneseq }
  0x25   : > { %686 = vset.pattern.permute.xlu0 %v786_v0  ;;  %586 = vmatprep.subr.mxu0 %v228_v2  ;;  %vm229_vm0 = vcmask 130048   ;;  %v787_v8 = vmov 0.0   ;;  %v360_v12 = vld [vmem:[#allocation3 + $0x78] sm:$0xff]  ;;  %v359_v13 = vld [vmem:[#allocation3 + $0x70] sm:$0xff]  ;;  %vm311_vm3 = vcmask 253952   ;;  %v358_v14 = vld [vmem:[#allocation3 + $0x68] sm:$0xff] }
  0x26   : > { %s207_s9 = scalar_select %p206_p8, %s839_s19, 1  ;;  %587 = vmatpush3.msra.mxu0 %v228_v2  ;;  %v214_v6 = vand.u32 127, %v213_v5  ;;  %593 = vmatprep.subr.mxu1 %v360_v12  ;;  %313 = vst.msk [vmem:[#allocation2 + $0x8] sm:$0x1] %vm311_vm3, %v787_v8  ;;  %312 = vst.msk [vmem:[#allocation2] sm:$0x1] %vm311_vm3, %v787_v8 }
  0x27   : > { %588 = vmatprep.subr.mxu0 %v227_v3  ;;  %594 = vmatpush3.msra.mxu1 %v360_v12  ;;  %v357_v15 = vld [vmem:[#allocation3 + $0x60] sm:$0xff]  ;;  %v356_v16 = vld [vmem:[#allocation3 + $0x58] sm:$0xff]  ;;  %v355_v17 = vld [vmem:[#allocation3 + $0x50] sm:$0xff]  ;;  %vm314_vm4 = vcmask 260096   ;;  %s788_s27 = smov 32   ;;  %s789_s28 = smov 64  }
  0x28   : > { %s562_s10 = sshll.u32 %s207_s9, 4  ;;  %589 = vmatpush3.msra.mxu0 %v227_v3  ;;  %595 = vmatprep.subr.mxu1 %v359_v13  ;;  %v354_v18 = vld [vmem:[#allocation3 + $0x48] sm:$0xff]  ;;  %v353_v19 = vld [vmem:[#allocation3 + $0x40] sm:$0xff]  ;;  %v352_v20 = vld [vmem:[#allocation3 + $0x38] sm:$0xff]  ;;  %vm325_vm5 = vcmask 523520   ;;  %vm337_vm6 = vcmask 778752  }
  0x29   : > { %s210_s13 = scalar_lea.vmem %s955_s0, %s562_s10  ;;  %596 = vmatpush3.msra.mxu1 %v359_v13  ;;  %v351_v21 = vld [vmem:[#allocation3 + $0x30] sm:$0xff]  ;;  %v350_v22 = vld [vmem:[#allocation3 + $0x28] sm:$0xff]  ;;  %v349_v23 = vld [vmem:[#allocation3 + $0x20] sm:$0xff]  ;;  %vm334_vm7 = vcmask 785921   ;;  %vm340_vm8 = vcmask 1048320   ;;  %s203_s5 = sand.u32 1, %s773_s16  }
  0x2a   : > { %v211_v1 = vld [vmem:[%s210_s13] sm:$0xff]  ;;  %v212_v4 = vld [vmem:[%s210_s13 + $0x8] sm:$0xff]  ;;  %597 = vmatprep.subr.mxu1 %v358_v14  ;;  %v346_v26 = vld [vmem:[#allocation3 + $0x8] sm:$0xff]  ;;  %s549_s6 = sshll.u32 %s203_s5, 4  ;;  %s563_s9 = sshll.u32 %s839_s19, 8 }
  0x2b   : > { %216 = vperm.xlu0 %686, %v211_v1   ;;  %598 = vmatpush3.msra.mxu1 %v358_v14  ;;  %v348_v24 = vld [vmem:[#allocation3 + $0x18] sm:$0xff]  ;;  %v347_v25 = vld [vmem:[#allocation3 + $0x10] sm:$0xff]  ;;  %v345_v28 = vld [vmem:[#allocation3] sm:$0xff]  ;;  %s205_s7 = scalar_lea.vmem [#allocation6], %s549_s6  ;;  %s913_s12 = scalar_lea.hbm %s959_s4, %s563_s9 }
  0x2c   : > { %599 = vmatprep.subr.mxu1 %v357_v15  ;;  %v556_v36 = vld [vmem:[%s958_s3] ss:$0 sm:$0xff]  ;;  %s469_s8 = sshll.u32 %s205_s7, 4  ;;  %s915_s13 = scalar_lea.sflag [#allocation5], %s203_s5  ;;  %s908_s8 = int_to_ptr.vmem [resolvable:$true] %s469_s8 }
  0x2d   : > { %600 = vmatpush3.msra.mxu1 %v357_v15  ;;  %s717_s19 = scalar_lea.vmem %s908_s8, 256  ;;  %s790_s14 = smov [#allocation6]  }
  0x2e   : > { %601 = vmatprep.subr.mxu1 %v356_v16  ;;  %p718_p6 = scmp.ne.s32.totalorder %s908_s8, %s717_s19  ;;  %s721_s20 = sshll.u32 %s790_s14, 4  ;;  %s722_s20 = int_to_ptr.vmem [resolvable:$false] %s721_s20 }
  0x2f   : > { %219 = vperm.xlu0 %686, %v212_v4   ;;  %602 = vmatpush3.msra.mxu1 %v356_v16  ;;  %s723_s22 = scalar_lea.vmem %s722_s20, 512  ;;  %p724_p11 = scmp.lt.s32.totalorder %s908_s8, %s722_s20 }
  0x30   : > { %603 = vmatprep.subr.mxu1 %v355_v17  ;;  %p719_p9 = pnand %p718_p6, %p856_p5  ;;  %p725_p12 = scmp.lt.s32.totalorder %s723_s22, %s717_s19 }
  0x31   : > { %604 = vmatpush3.msra.mxu1 %v355_v17 }
  0x32   : > { %605 = vmatprep.subr.mxu1 %v354_v18  ;;  %p720_p10 = pneg %p719_p9  ;;  %p726_p13 = por %p725_p12, %p724_p11 }
  0x33   : > { %606 = vmatpush3.msra.mxu1 %v354_v18 }
  0x34   : > { %607 = vmatprep.subr.mxu1 %v353_v19  ;;  %p727_p0 = pnand %p726_p13, %p720_p10 }
  0x35   : > { %608 = vmatpush3.msra.mxu1 %v353_v19 }
  0x36   : > { %609 = vmatprep.subr.mxu1 %v352_v20 }
  0x37   : > { %610 = vmatpush3.msra.mxu1 %v352_v20 }
  0x38   : > { %611 = vmatprep.subr.mxu1 %v351_v21 }
  0x39   : > { %612 = vmatpush3.msra.mxu1 %v351_v21 }
  0x3a   : > { %613 = vmatprep.subr.mxu1 %v350_v22 }
  0x3b   : > { %614 = vmatpush3.msra.mxu1 %v350_v22 }
  0x3c   : > { %615 = vmatprep.subr.mxu1 %v349_v23 }
  0x3d   : > { %616 = vmatpush3.msra.mxu1 %v349_v23 }
  0x3e   : > { %617 = vmatprep.subr.mxu1 %v348_v24 }
  0x3f   : > { %618 = vmatpush3.msra.mxu1 %v348_v24 }
  0x40   : > { %619 = vmatprep.subr.mxu1 %v347_v25 }
  0x41   : > { %620 = vmatpush3.msra.mxu1 %v347_v25 }
  0x42   : > { %621 = vmatprep.subr.mxu1 %v346_v26 }
  0x43   : > { %622 = vmatpush3.msra.mxu1 %v346_v26 }
  0x44   : > { %623 = vmatprep.subr.mxu1 %v345_v28 }
  0x45   : > { %624 = vmatpush3.msra.mxu1 %v345_v28 }
  0xa6   : > { %v217_v7 = vpop.permute.xlu0 %216 }
  0xa7   : > { %vm221_vm1 = vcmp.eq.s32.totalorder %v214_v6, %v217_v7 }
  0xa8   : > { %v552_v9 = vsel %vm221_vm1, 1.0, %v787_v8 }
  0xa9   : > { %590 = vmatprep.mubr.msk.f32.mxu0 %vm229_vm0, %v552_v9 }
  0xaa   : > { %v220_v10 = vpop.permute.xlu0 %219 }
  0xab   : > { %vm222_vm2 = vcmp.eq.s32.totalorder %v214_v6, %v220_v10 }
  0xac   : > { %v553_v11 = vsel %vm222_vm2, 1.0, %v787_v8 }
  0xad   : > { %591 = vmatmul.mubr.msk.f32.vlgmr.msra.gmra.mxu0 %vm229_vm0, %v553_v11 }
 0x16d   : > { %v592_v27 = vpop.f32.mrf.mxu0 }
 0x16e   : > { %316 = vst.msk [vmem:[#allocation2 + $0x9] sm:$0x7f] %vm314_vm4, %v592_v27  ;;  %321 = vrot.lane.b32.xlu1 %v592_v27, %s788_s27 }
 0x16f   : > { %v302_v29 = vpop.f32.mrf.mxu0 }
 0x170   : > { %315 = vst.msk [vmem:[#allocation2 + $0x1] sm:$0x7f] %vm314_vm4, %v302_v29  ;;  %328 = vrot.lane.b32.xlu0 %v302_v29, %s789_s28 }
 0x172   : > { %319 = vrot.lane.b32.xlu1 %v302_v29, %s788_s27 }
 0x176   : > { %330 = vrot.lane.b32.xlu1 %v592_v27, %s789_s28 }
 0x1e0   : > { %v322_v30 = vpop.permute.xlu1 %321 }
 0x1e1   : > { %327 = vst.msk [vmem:[#allocation2 + $0x8] sm:$0xff] %vm325_vm5, %v322_v30 }
 0x1e2   : > { %339 = vst.msk [vmem:[#allocation2 + $0xf] sm:$0x1] %vm337_vm6, %v787_v8  ;;  %v329_v32 = vpop.permute.xlu0 %328 }
 0x1e4   : > { %v320_v31 = vpop.permute.xlu1 %319 }
 0x1e5   : > { %326 = vst.msk [vmem:[#allocation2] sm:$0xff] %vm325_vm5, %v320_v31 }
 0x1e6   : > { %338 = vst.msk [vmem:[#allocation2 + $0x7] sm:$0x1] %vm337_vm6, %v787_v8 }
 0x1e7   : > { %335 = vst.msk [vmem:[#allocation2 - $0x1] sm:$0xfe] %vm334_vm7, %v329_v32 }
 0x1e8   : > { %341 = vst.msk [vmem:[#allocation2] sm:$0xff] %vm340_vm8, %v787_v8  ;;  %v331_v33 = vpop.permute.xlu1 %330 }
 0x1e9   : > { %336 = vst.msk [vmem:[#allocation2 + $0x7] sm:$0xfe] %vm334_vm7, %v331_v33 }
 0x1ea   : > { %342 = vst.msk [vmem:[#allocation2 + $0x8] sm:$0xff] %vm340_vm8, %v787_v8 }
 0x1ef   : > { %v343_v34 = vld [vmem:[#allocation2] sm:$0xff] }
 0x1f0   : > { %625 = vmatprep.mubr.f32.mxu1 %v343_v34 }
 0x1f1   : > { %v344_v35 = vld [vmem:[#allocation2 + $0x8] sm:$0xff] }
 0x1f2   : > { %626 = vmatmul.mubr.f32.vlgmr.msra.gmra.mxu1 %v344_v35 }
 0x2b2   : > { %v627_v37 = vpop.f32.mrf.mxu1 }
 0x2b3   : > { %v440_v38 = vadd.f32 %v627_v37, %v556_v36 }
 0x2b4   : > { %v434_v39 = vpop.f32.mrf.mxu1 }
 0x2b5   : > { %v446_v40 = vmul.f32 0.70710677, %v440_v38  ;;  %v435_v41 = vadd.f32 %v556_v36, %v434_v39  ;;  %v444_v44 = vmul.f32 0.5, %v440_v38 }
 0x2b7   : > { %687 = verf.f32 %v446_v40  ;;  %v445_v42 = vmul.f32 0.70710677, %v435_v41  ;;  %v443_v48 = vmul.f32 0.5, %v435_v41 }
 0x2b9   : > { %689 = verf.f32 %v445_v42 }
 0x2c4   : > { %v688_v43 = vpop.eup %687 }
 0x2c5   : > { %v450_v45 = vadd.f32 1.0, %v688_v43 }
 0x2c6   : > { %v690_v46 = vpop.eup %689 }
 0x2c7   : > { %v452_v47 = vmul.f32 %v450_v45, %v444_v44  ;;  %v449_v49 = vadd.f32 1.0, %v690_v46 }
 0x2c9   : > { %454 = vst [vmem:[%s205_s7 + $0x8] sm:$0xff] %v452_v47  ;;  %v451_v50 = vmul.f32 %v449_v49, %v443_v48 }
 0x2cb   : > { %453 = vst [vmem:[%s205_s7] sm:$0xff] %v451_v50 }
 0x2cc   : > { %730 = shalt.err (!%p727_p0)
}
 0x2cd   : > { %s731_s23 = scalar_lea.hbm %s913_s12, 256  ;;  %s735_s29 = scalar_lea.hbm %s959_s4, 512 }
 0x2ce   : > { %p732_p1 = scmp.ne.s32.totalorder %s913_s12, %s731_s23  ;;  %p736_p4 = scmp.lt.s32.totalorder %s913_s12, %s959_s4 }
 0x2cf   : > { %p737_p7 = scmp.lt.s32.totalorder %s735_s29, %s731_s23 }
 0x2d0   : > { %p733_p2 = pnand %p732_p1, %p856_p5 }
 0x2d1   : > { %p738_p8 = por %p737_p7, %p736_p4 }
 0x2d2   : > { %p734_p3 = pneg %p733_p2 }
 0x2d4   : > { %p739_p6 = pnand %p738_p8, %p734_p3 }
 0x2d6   : > { %742 = shalt.err (!%p739_p6)
}
 0x2d7   : > { %s791_s6 = smov 128   ;;  %s792_s7 = smov 8  }
 0x2d8   : > { %632 = dma.vmem_to_hbm [thread:$0]  (%p856_p5), %s908_s8, 256, %s913_s12, %s915_s13, %s791_s6, %s791_s6, %s792_s7  }
 0x2d9 PF: > { %p644_p9 = scmp.ge.s32.totalorder %s781_s18, 2  ;;  %s484_s9 = sand.u32 1, %s769_s15  }
 0x2da   : > { %p963_p10 = scmp.ne.s32.totalorder %s961_s26, 0  ;;  %s485_s10 = scalar_lea.sflag [#allocation5], %s484_s9 }
 0x2dc   : > { %p639_p11 = pnand %p644_p9, %p963_p10 }
 0x2de   : > { %p640_p12 = pneg %p639_p11 }
 0x2e0   : > { %764 = dma.done.wait (%p640_p12), %s485_s10, 256  }
 0x2e1   : > { %766 = vsyncadd (%p640_p12), %s485_s10, 4294967040  ;;  %p15_p13 = scmp.ge.s32.totalorder %s843_s21, 4   ;;  %s964_s15 = smov %s773_s16 }
 0x2e2   : > { %s965_s16 = smov %s777_s17  ;;  %s966_s17 = smov %s854_s24 }
 0x2e3   : > { %s967_s18 = smov %s843_s21  ;;  %17 = sbr.rel (!%p15_p13) target bundleno = 4 (0x4), region = 76 }
 0x2e8   :  { %490 = vsyncpa [#allocation4], 1 }
 0x2e9   :  { %492 = vsyncpa [#allocation4 + $0x1], 1 }
 0x2ea   :  { %493 = vsyncpa [#allocation5], 1 }
 0x2eb   :  { %495 = vsyncpa [#allocation5 + $0x1], 1 }

</bundles_post_ra>
